<compile_context>
chip_gen: v7x
topology: tpu7x:2x2x1
jax: 0.10.0
libtpu: 0.0.40
codegen_flags: <defaults>
</compile_context>

<pallas_src>
import math
import functools

import numpy as np
import jax
import jax.numpy as jnp
from jax.experimental import pallas as pl
from jax.experimental.pallas import tpu as pltpu


def _vmem_limit_bytes():
    """~75% of per-core VMEM (96 MiB on v5e/v6e, 48 MiB on v7x); conservative
    48 MiB fallback if the hardware query is unavailable."""
    cap = 64 * 1024 * 1024
    try:
        info_cap = int(pltpu.get_tpu_info().vmem_capacity_bytes)
        if info_cap >= 32 * 1024 * 1024:
            cap = info_cap
    except Exception:
        pass
    return cap * 3 // 4


def _pick_group(h, bh, d, max_g=8):
    """Heads per grid step: a divisor of H (so each group is G contiguous heads
    of one batch and the context can be written straight into [B, L_Q, H*D]);
    prefer >= 2 grid steps (megacore) and a lane-dense packed width g*d % 128 == 0."""
    divisors = [g for g in range(min(h, max_g), 0, -1) if h % g == 0]
    return max(divisors, key=lambda g: ((bh // g) >= 2, (g * d) % 128 == 0, g))


def _pick_q_tile(l_q, l_k):
    """Query tile for kernel 1; keeps the (TQ, L_K) f32 score tile bounded."""
    max_tile = 512 if l_k <= 4096 else 256
    if l_q <= max_tile:
        return l_q
    for t in (512, 384, 256, 128):
        if t <= max_tile and l_q % t == 0:
            return t
    return l_q


def _pick_ctx_tile(l_q):
    """Query tile for kernel 2's context scatter (only matters at long L_Q)."""
    if l_q <= 1024:
        return l_q
    for t in (1024, 512, 256, 128):
        if l_q % t == 0:
            return t
    return l_q


# --------------------------------------------------------------------------
# Kernel 1: MXU scores + ProbSparse measure M (no K_sample materialization)
# --------------------------------------------------------------------------
def _qk_sparsity_kernel(c_ref, q_ref, k_ref, m_ref, *, inv_lk, G, TQ):
    # Sample-count tile (int8 in HBM/VMEM), shared across the G heads of this step.
    c_f32 = c_ref[...].astype(jnp.float32)                 # (TQ, L_K)
    sel = c_f32 > 0.0                                       # sampled-column mask
    c_bf = c_f32.astype(jnp.bfloat16)                       # MXU operand
    lane_iota = jax.lax.broadcasted_iota(jnp.int32, (TQ, G), 1)

    def head(g, acc):                                       # one head at a time:
        q = q_ref[0, g]                                     # (TQ, E)  bf16
        k = k_ref[0, g]                                     # (L_K, E) bf16
        s = jax.lax.dot_general(                            # (TQ, L_K) f32 on MXU
            q, k, (((1,), (1,)), ((), ())),
            preferred_element_type=jnp.float32)
        smax = jnp.max(jnp.where(sel, s, -jnp.inf), axis=-1, keepdims=True)
        # Weighted sample sum on the MXU: sum_j c[i,j]*S[i,j] = q_i . (counts @ K)_i
        ck = jnp.dot(c_bf, k, preferred_element_type=jnp.float32)      # (TQ, E)
        ssum = jnp.sum(q.astype(jnp.float32) * ck, axis=-1, keepdims=True)
        m_col = smax - ssum * inv_lk                        # (TQ, 1)
        return acc + jnp.where(lane_iota == g, m_col, 0.0)  # place column g

    acc = jax.lax.fori_loop(0, G, head, jnp.zeros((TQ, G), jnp.float32))
    m_ref[0] = jnp.transpose(acc)                           # lane-dense (G, TQ) store


def _sparsity_measure(qb, kb, counts):
    """qb: [NB,G,L_Q,E] bf16, kb: [NB,G,L_K,E] bf16, counts: [L_Q,L_K] int8
    -> M: [NB, G, L_Q] f32."""
    NB, G, L_Q, E = qb.shape
    L_K = kb.shape[2]
    TQ = _pick_q_tile(L_Q, L_K)
    n_qt = L_Q // TQ
    kernel = functools.partial(_qk_sparsity_kernel, inv_lk=1.0 / L_K, G=G, TQ=TQ)
    return pl.pallas_call(
        kernel,
        out_shape=jax.ShapeDtypeStruct((NB, G, L_Q), jnp.float32),
        grid=(NB, n_qt),
        in_specs=[
            pl.BlockSpec((TQ, L_K), lambda i, j: (j, 0)),          # int8 counts
            pl.BlockSpec((1, G, TQ, E), lambda i, j: (i, 0, j, 0)),
            pl.BlockSpec((1, G, L_K, E), lambda i, j: (i, 0, 0, 0)),
        ],
        out_specs=pl.BlockSpec((1, G, TQ), lambda i, j: (i, 0, j)),
        compiler_params=pltpu.CompilerParams(
            dimension_semantics=("parallel", "parallel"),
            vmem_limit_bytes=_vmem_limit_bytes()),
    )(counts, qb, kb)


# --------------------------------------------------------------------------
# Kernel 2: top-u attention + fused initial-context / top-u scatter
# --------------------------------------------------------------------------
def _topk_ctx_kernel(mtop_ref, q_ref, k_ref, v_ref, ctx_ref, *maybe_attn,
                     scale, G, TQ, inv_lk, emit_attn):
    attn_ref = maybe_attn[0] if emit_attn else None
    row0 = pl.program_id(1) * TQ                            # first L_Q row of this tile
    ctx_cols = []
    for g in range(G):                                      # static unroll (small temps)
        q = q_ref[0, g]                                     # (u, E)   bf16
        k = k_ref[0, g]                                     # (L_K, E) bf16
        v = v_ref[0, g]                                     # (L_K, D) bf16

        s = jax.lax.dot_general(                            # (u, L_K) f32 on MXU
            q, k, (((1,), (1,)), ((), ())),
            preferred_element_type=jnp.float32) * scale
        m = jnp.max(s, axis=-1, keepdims=True)
        p = jnp.exp(s - m)
        denom = jnp.sum(p, axis=-1, keepdims=True)
        attn = p * pl.reciprocal(denom, approx=False)       # softmax rows, f32
        if emit_attn:
            attn_ref[0, g] = attn.astype(jnp.bfloat16)      # bf16 store (halves traffic)

        ctx_top = jnp.dot(attn.astype(v.dtype), v,          # (u, D) f32 on MXU
                          preferred_element_type=jnp.float32)
        v_mean = jnp.sum(v.astype(jnp.float32), axis=0,
                         keepdims=True) * inv_lk            # (1, D)

        # Dense scatter of the top-u rows via a bf16 one-hot matmul (single-pass MXU):
        # P[l, r] = 1 iff m_top[g, r] == row l (rows of this q-tile only).
        idx = mtop_ref[0, g]                                # (u,) int32
        row_id = jax.lax.broadcasted_iota(
            jnp.int32, (TQ, idx.shape[0]), 0) + row0
        match = row_id == idx[None, :]                      # (TQ, u)
        P = match.astype(jnp.float32).astype(jnp.bfloat16)
        scattered = jnp.dot(P, ctx_top.astype(jnp.bfloat16),
                            preferred_element_type=jnp.float32)   # (TQ, D)
        in_top = jnp.sum(match.astype(jnp.float32), axis=1, keepdims=True)
        ctx_cols.append(scattered + (1.0 - in_top) * v_mean)      # (TQ, D)

    # Single lane-dense store of the packed context for all G heads.
    ctx_ref[0] = jnp.concatenate(ctx_cols, axis=1)          # (TQ, G*D)


def _topk_attention(m_top4, q_red, kb, vb, scale, L_Q, B, H, emit_attn):
    """m_top4: [NB,G,u] i32, q_red: [NB,G,u,E] bf16, kb: [NB,G,L_K,E] bf16,
    vb: [NB,G,L_K,D] bf16 -> ctx [B,L_Q,H*D] f32 (+ attn_top [NB,G,u,L_K] bf16)."""
    NB, G, u, E = q_red.shape
    L_K = kb.shape[2]
    D = vb.shape[3]
    TQ = _pick_ctx_tile(L_Q)
    n_qt = L_Q // TQ
    HpG = H // G
    kernel = functools.partial(_topk_ctx_kernel, scale=scale, G=G, TQ=TQ,
                               inv_lk=1.0 / L_K, emit_attn=emit_attn)

    # Context written directly in the final [B, L_Q, H*D] layout: grid step i
    # covers batch i // (H//G), heads (i % (H//G))*G .. +G-1.
    ctx_shape = jax.ShapeDtypeStruct((B, L_Q, H * D), jnp.float32)
    ctx_spec = pl.BlockSpec((1, TQ, G * D), lambda i, j: (i // HpG, j, i % HpG))
    if emit_attn:
        out_shape = (ctx_shape,
                     jax.ShapeDtypeStruct((NB, G, u, L_K), jnp.bfloat16))
        out_specs = (ctx_spec,
                     pl.BlockSpec((1, G, u, L_K), lambda i, j: (i, 0, 0, 0)))
    else:
        out_shape = ctx_shape
        out_specs = ctx_spec

    return pl.pallas_call(
        kernel,
        out_shape=out_shape,
        grid=(NB, n_qt),
        in_specs=[
            pl.BlockSpec((1, G, u), lambda i, j: (i, 0, 0)),
            pl.BlockSpec((1, G, u, E), lambda i, j: (i, 0, 0, 0)),
            pl.BlockSpec((1, G, L_K, E), lambda i, j: (i, 0, 0, 0)),
            pl.BlockSpec((1, G, L_K, D), lambda i, j: (i, 0, 0, 0)),
        ],
        out_specs=out_specs,
        compiler_params=pltpu.CompilerParams(
            dimension_semantics=("parallel", "arbitrary"),
            vmem_limit_bytes=_vmem_limit_bytes()),
    )(m_top4, q_red, kb, vb)


# --------------------------------------------------------------------------
# Full forward (glue in plain JAX: sampling, top-k, optional full attn map)
# --------------------------------------------------------------------------
def prob_attention_forward(queries, keys, values, *, factor=5, scale=None,
                           sample_key=None, output_attention=True,
                           return_aux=False):
    B, L_Q, H, E = queries.shape
    _, L_K, _, D = values.shape
    BH = B * H

    q = jnp.transpose(queries, (0, 2, 1, 3))      # [B,H,L_Q,E]
    k = jnp.transpose(keys, (0, 2, 1, 3))         # [B,H,L_K,E]
    v = jnp.transpose(values, (0, 2, 1, 3))       # [B,H,L_K,D]

    U_part = min(int(factor * math.ceil(math.log(L_K))), L_K)
    u = min(int(factor * math.ceil(math.log(L_Q))), L_Q)

    # torch.randint(L_K, (L_Q, sample_k)) equivalent (different RNG stream).
    if sample_key is None:
        sample_key = jax.random.PRNGKey(0)
    index_sample = jax.random.randint(sample_key, (L_Q, U_part), 0, L_K)

    # Per-row sample-count matrix (shared across B,H like the reference's single
    # randint draw), stored narrow: counts[i, k] = #{j : index_sample[i, j] == k}.
    cnt_dtype = jnp.int8 if U_part < 128 else jnp.int32
    counts = (jnp.zeros((L_Q, L_K), jnp.int32)
              .at[jnp.arange(L_Q)[:, None], index_sample].add(1)
              .astype(cnt_dtype))

    G = _pick_group(H, BH, D)
    NB = BH // G

    # bf16 MXU operands (f32 accumulation inside the kernels).
    qb = q.astype(jnp.bfloat16).reshape(NB, G, L_Q, E)
    kb = k.astype(jnp.bfloat16).reshape(NB, G, L_K, E)
    vb = v.astype(jnp.bfloat16).reshape(NB, G, L_K, D)

    # --- Pallas kernel 1: sparsity measure M ---
    M = _sparsity_measure(qb, kb, counts).reshape(B, H, L_Q)

    _, m_top = jax.lax.top_k(M, u)                            # [B,H,u]

    b_idx = jnp.arange(B)[:, None, None]
    h_idx = jnp.arange(H)[None, :, None]
    q_reduce = q[b_idx, h_idx, m_top].astype(jnp.bfloat16).reshape(NB, G, u, E)
    m_top4 = m_top.astype(jnp.int32).reshape(NB, G, u)

    sc = float(scale) if scale is not None else 1.0 / math.sqrt(E)
    emit_attn = bool(output_attention) or bool(return_aux)

    # --- Pallas kernel 2: top-u attention + fused context scatter ---
    if emit_attn:
        ctx, attn_top_bf = _topk_attention(m_top4, q_reduce, kb, vb, sc, L_Q,
                                           B, H, emit_attn=True)
        attn_top = attn_top_bf.reshape(B, H, u, L_K).astype(jnp.float32)
    else:
        ctx = _topk_attention(m_top4, q_reduce, kb, vb, sc, L_Q,
                              B, H, emit_attn=False)
        attn_top = None

    # Kernel 2 already produced the final layout: [B, L_Q, H*D] == [B, L_Q, H, D].
    out_context = ctx.reshape(B, L_Q, H, D)

    attns = None
    if output_attention:
        # TODO(synk): dense attns map kept in XLA (gated off the hot path); it is
        # inherently a B*H*L*L tensor and dwarfs both kernels when enabled.
        # NOTE: like the PyTorch code, this assumes L_Q == L_K for row indexing.
        attns = jnp.full((B, H, L_K, L_K), 1.0 / L_K, dtype=jnp.float32)
        attns = attns.at[b_idx, h_idx, m_top].set(attn_top)

    if return_aux:
        aux = dict(index_sample=index_sample, M=M, m_top=m_top,
                   attn_top=attn_top)
        return out_context, attns, aux
    return out_context, attns


# TODO(synk): nn.Dropout(attention_dropout) is constructed in __init__ but never
# applied in the reference forward pass, so it is intentionally omitted here.
# TODO(synk): E/D < 128 minor dims of Q/K/V blocks may be lane-padded in VMEM;
# VMEM limits are set with headroom instead of repacking heads onto the lane axis.

if __name__ == "__main__":
    key = jax.random.PRNGKey(0)
    kq, kk, kv, ksamp = jax.random.split(key, 4)

    B, L, H, E = 2, 64, 4, 32   # L_Q = L_K = 64, D = E = 32
    queries = jax.random.normal(kq, (B, L, H, E), dtype=jnp.float32)
    keys = jax.random.normal(kk, (B, L, H, E), dtype=jnp.float32)
    values = jax.random.normal(kv, (B, L, H, E), dtype=jnp.float32)

    context, attns, aux = prob_attention_forward(
        queries, keys, values, factor=5, scale=None,
        sample_key=ksamp, output_attention=True, return_aux=True)
    jax.block_until_ready((context, attns))

    assert context.shape == (B, L, H, E)
    assert attns.shape == (B, H, L, L)

    # --- correctness check against a pure-JAX reference (same bf16 operands) ---
    qT = jnp.transpose(queries, (0, 2, 1, 3)).astype(jnp.bfloat16)
    kT = jnp.transpose(keys, (0, 2, 1, 3)).astype(jnp.bfloat16)
    vT = jnp.transpose(values, (0, 2, 1, 3)).astype(jnp.bfloat16)

    S = jnp.einsum("bhqe,bhke->bhqk", qT, kT,
                   preferred_element_type=jnp.float32)        # full scores

    # kernel-1 reference: gather sampled columns (with duplicates) and build M
    idx = aux["index_sample"]
    idx_b = jnp.broadcast_to(idx[None, None], (B, H, L, idx.shape[-1]))
    qk_sample = jnp.take_along_axis(S, idx_b, axis=-1)
    M_ref = qk_sample.max(-1) - qk_sample.sum(-1) / L
    np.testing.assert_allclose(np.asarray(aux["M"]), np.asarray(M_ref),
                               rtol=1e-2, atol=1e-2)

    # kernel-2 reference (same selected queries as the implementation)
    m_top = aux["m_top"]
    b_idx = jnp.arange(B)[:, None, None]
    h_idx = jnp.arange(H)[None, :, None]
    sc = 1.0 / math.sqrt(E)
    scores_top = S[b_idx, h_idx, m_top] * sc                  # (B,H,u,L)
    attn_ref = jax.nn.softmax(scores_top, axis=-1)
    np.testing.assert_allclose(np.asarray(aux["attn_top"]), np.asarray(attn_ref),
                               rtol=1e-2, atol=1e-2)

    ctx_top_ref = jnp.einsum("bhuk,bhkd->bhud", attn_ref.astype(jnp.bfloat16),
                             vT, preferred_element_type=jnp.float32)
    v_mean_ref = jnp.mean(vT.astype(jnp.float32), axis=2)     # (B,H,D)
    ctx_full_ref = jnp.broadcast_to(v_mean_ref[:, :, None, :], (B, H, L, E))
    ctx_full_ref = ctx_full_ref.at[b_idx, h_idx, m_top].set(ctx_top_ref)
    context_ref = jnp.transpose(ctx_full_ref, (0, 2, 1, 3))
    np.testing.assert_allclose(np.asarray(context), np.asarray(context_ref),
                               rtol=1e-2, atol=1e-2)

    attns_ref = jnp.full((B, H, L, L), 1.0 / L, dtype=jnp.float32)
    attns_ref = attns_ref.at[b_idx, h_idx, m_top].set(attn_ref)
    np.testing.assert_allclose(np.asarray(attns), np.asarray(attns_ref),
                               rtol=1e-2, atol=1e-2)

    print("KERNEL_OK")
</pallas_src>

<mosaic_0001>
module attributes {stable_mosaic.version = 11 : i64} {
  func.func @_qk_sparsity_kernel(%arg0: i32, %arg1: i32, %arg2: memref<64x64xi8, #tpu.memory_space<vmem>>, %arg3: memref<1x4x64x32xbf16, #tpu.memory_space<vmem>>, %arg4: memref<1x4x64x32xbf16, #tpu.memory_space<vmem>>, %arg5: memref<1x4x64xf32, #tpu.memory_space<vmem>>) attributes {dimension_semantics = [#tpu.dimension_semantics<parallel>, #tpu.dimension_semantics<parallel>], iteration_bounds = array<i64: 2, 1>, scalar_prefetch = 0 : i64, scratch_operands = 0 : i64, tpu.core_type = #tpu.core_type<tc>, window_params = [{transform_indices = @transform_0, window_bounds = array<i64: 64, 64>}, {transform_indices = @transform_1, window_bounds = array<i64: 1, 4, 64, 32>}, {transform_indices = @transform_2, window_bounds = array<i64: 1, 4, 64, 32>}, {transform_indices = @transform_3, window_bounds = array<i64: 1, 4, 64>}]} {
    %c0 = arith.constant 0 : index
    %c0_0 = arith.constant 0 : index
    %0 = vector.load %arg2[%c0, %c0_0] : memref<64x64xi8, #tpu.memory_space<vmem>>, vector<64x64xi8>
    %1 = arith.sitofp %0 : vector<64x64xi8> to vector<64x64xf32>
    %cst = arith.constant 0.000000e+00 : f32
    %2 = vector.broadcast %cst : f32 to vector<64x64xf32>
    %3 = arith.cmpf ogt, %1, %2 : vector<64x64xf32>
    %4 = arith.truncf %1 : vector<64x64xf32> to vector<64x64xbf16>
    %5 = tpu.iota {dimensions = array<i32: 1>} : vector<64x4xi32>
    %cst_1 = arith.constant 0.000000e+00 : f32
    %6 = vector.broadcast %cst_1 : f32 to vector<64x4xf32>
    %c0_i32 = arith.constant 0 : i32
    %c4_i32 = arith.constant 4 : i32
    %7 = arith.addi %c0_i32, %c4_i32 : i32
    %c1_i32 = arith.constant 1 : i32
    %8 = scf.for %arg6 = %c0_i32 to %7 step %c1_i32 iter_args(%arg7 = %6) -> (vector<64x4xf32>)  : i32 {
      %c0_6 = arith.constant 0 : index
      %13 = arith.index_cast %arg6 : i32 to index
      %c0_7 = arith.constant 0 : index
      %c0_8 = arith.constant 0 : index
      %14 = vector.load %arg3[%c0_6, %13, %c0_7, %c0_8] : memref<1x4x64x32xbf16, #tpu.memory_space<vmem>>, vector<1x1x64x32xbf16>
      %15 = vector.shape_cast %14 : vector<1x1x64x32xbf16> to vector<64x32xbf16>
      %c0_9 = arith.constant 0 : index
      %16 = arith.index_cast %arg6 : i32 to index
      %c0_10 = arith.constant 0 : index
      %c0_11 = arith.constant 0 : index
      %17 = vector.load %arg4[%c0_9, %16, %c0_10, %c0_11] : memref<1x4x64x32xbf16, #tpu.memory_space<vmem>>, vector<1x1x64x32xbf16>
      %18 = vector.shape_cast %17 : vector<1x1x64x32xbf16> to vector<64x32xbf16>
      %cst_12 = arith.constant dense<0.000000e+00> : vector<64x64xf32>
      %19 = tpu.matmul %15, %18, %cst_12 {dimension_numbers = #tpu.dot_dimension_numbers<[1], [1], [0], [0], [0, 0, 1, 0], [], []>} : vector<64x32xbf16>, vector<64x32xbf16>, vector<64x64xf32> -> vector<64x64xf32>
      %cst_13 = arith.constant 0xFF800000 : f32
      %20 = vector.broadcast %cst_13 : f32 to vector<64x64xf32>
      %21 = arith.select %3, %19, %20 : vector<64x64xi1>, vector<64x64xf32>
      %cst_14 = arith.constant dense<0xFF800000> : vector<64xf32>
      %22 = vector.multi_reduction <maximumf>, %21, %cst_14 [1] : vector<64x64xf32> to vector<64xf32>
      %23 = vector.shape_cast %22 : vector<64xf32> to vector<64x1xf32>
      %cst_15 = arith.constant dense<0.000000e+00> : vector<64x32xf32>
      %24 = tpu.matmul %4, %18, %cst_15 {dimension_numbers = #tpu.dot_dimension_numbers<[1], [0], [0], [1], [0, 0, 1, 1], [], []>} : vector<64x64xbf16>, vector<64x32xbf16>, vector<64x32xf32> -> vector<64x32xf32>
      %25 = arith.extf %15 : vector<64x32xbf16> to vector<64x32xf32>
      %26 = arith.mulf %25, %24 : vector<64x32xf32>
      %cst_16 = arith.constant dense<0.000000e+00> : vector<64xf32>
      %27 = vector.multi_reduction <add>, %26, %cst_16 [1] : vector<64x32xf32> to vector<64xf32>
      %28 = vector.shape_cast %27 : vector<64xf32> to vector<64x1xf32>
      %cst_17 = arith.constant 1.562500e-02 : f32
      %29 = vector.broadcast %cst_17 : f32 to vector<64x1xf32>
      %30 = arith.mulf %28, %29 : vector<64x1xf32>
      %31 = arith.subf %23, %30 : vector<64x1xf32>
      %32 = vector.broadcast %arg6 : i32 to vector<64x4xi32>
      %33 = arith.cmpi eq, %5, %32 : vector<64x4xi32>
      %cst_18 = arith.constant 0.000000e+00 : f32
      %34 = vector.shape_cast %31 : vector<64x1xf32> to vector<64x1xf32>
      %35 = vector.broadcast %34 : vector<64x1xf32> to vector<64x4xf32>
      %36 = vector.broadcast %cst_18 : f32 to vector<64x4xf32>
      %37 = arith.select %33, %35, %36 : vector<64x4xi1>, vector<64x4xf32>
      %38 = arith.addf %arg7, %37 : vector<64x4xf32>
      scf.yield %38 : vector<64x4xf32>
    }
    %c4_i32_2 = arith.constant 4 : i32
    %9 = tpu.transpose %8, [1, 0] : vector<64x4xf32> -> vector<4x64xf32>
    %c0_3 = arith.constant 0 : index
    %c0_4 = arith.constant 0 : index
    %c0_5 = arith.constant 0 : index
    %10 = vector.load %arg5[%c0_3, %c0_4, %c0_5] : memref<1x4x64xf32, #tpu.memory_space<vmem>>, vector<1x4x64xf32>
    %11 = vector.shape_cast %10 : vector<1x4x64xf32> to vector<4x64xf32>
    %12 = vector.shape_cast %9 : vector<4x64xf32> to vector<1x4x64xf32>
    tpu.vector_store %arg5[%c0_3, %c0_4, %c0_5], %12 {strides = array<i32>} : memref<1x4x64xf32, #tpu.memory_space<vmem>>, vector<1x4x64xf32>,
    return
  }
  func.func @transform_0(%arg0: i32, %arg1: i32) -> (i32, i32) {
    %c0_i32 = arith.constant 0 : i32
    %c0_i32_0 = arith.constant 0 : i32
    return %arg1, %c0_i32 : i32, i32
  }
  func.func @transform_1(%arg0: i32, %arg1: i32) -> (i32, i32, i32, i32) {
    %c0_i32 = arith.constant 0 : i32
    %c0_i32_0 = arith.constant 0 : i32
    %c0_i32_1 = arith.constant 0 : i32
    return %arg0, %c0_i32, %arg1, %c0_i32_0 : i32, i32, i32, i32
  }
  func.func @transform_2(%arg0: i32, %arg1: i32) -> (i32, i32, i32, i32) {
    %c0_i32 = arith.constant 0 : i32
    %c0_i32_0 = arith.constant 0 : i32
    %c0_i32_1 = arith.constant 0 : i32
    %c0_i32_2 = arith.constant 0 : i32
    return %arg0, %c0_i32, %c0_i32_0, %c0_i32_1 : i32, i32, i32, i32
  }
  func.func @transform_3(%arg0: i32, %arg1: i32) -> (i32, i32, i32) {
    %c0_i32 = arith.constant 0 : i32
    %c0_i32_0 = arith.constant 0 : i32
    return %arg0, %c0_i32, %arg1 : i32, i32, i32
  }
}

</mosaic_0001>

<bundles_post_ra>
// kernel: tpu_custom_call.1
= control target key start
LH: loop header
LB: loop body
LE: loop exit
PB: predicated region body
PF: predicated region fallthrough
CT: control target
= control target key end

     0   :  { %8 = vsyncpa [#allocation3], 0  ;;  %s1550_s0 = inlined_call_operand.vmem [shape: s8[64,64], index: 0, kind: input, shape index: {}]   ;;  %s1551_s1 = inlined_call_operand.vmem [shape: bf16[2,4,64,32], index: 1, kind: input, shape index: {}]   ;;  %s1552_s2 = inlined_call_operand.vmem [shape: bf16[2,4,64,32], index: 2, kind: input, shape index: {}]   ;;  %s1553_s3 = inlined_call_operand.hbm [shape: f32[2,4,64], index: 3, kind: output, shape index: {}]  }
   0x1   :  { %10 = vsyncpa [#allocation3 + $0x1], 0  ;;  %s1213_s12 = smov 0   ;;  %s1215_s13 = smov 0  }
   0x2   :  { %s1217_s14 = smov 0   ;;  %s1219_s15 = smov 0  }
   0x3   :  { %s1221_s16 = smov 0   ;;  %s1223_s17 = smov 0  }
   0x4 LB: > { %s810_s18 = sadd.s32 4294967295, %s1154_s17   ;;  %s811_s19 = sadd.s32 4294967294, %s1154_s17   ;;  %s1154_s17 = sphi %s1223_s17, %s16_s17   ;;  %s1150_s16 = sphi %s1221_s16, %s1570_s16   ;;  %s1146_s15 = sphi %s1219_s15, %s1569_s15   ;;  %s1142_s14 = sphi %s1217_s14, %s1568_s14   ;;  %s1138_s13 = sphi %s1215_s13, %s1567_s13   ;;  %s1134_s12 = sphi %s1213_s12, %s1566_s12  }
   0x5   : > { %s28_s20 = sadd.s32 1, %s1150_s16  ;;  %s117_s21 = sadd.s32 1, %s1142_s14 }
   0x6   : > { %p30_p0 = scmp.ge.s32.totalorder %s28_s20, 2  ;;  %p127_p1 = scmp.ne.s32.totalorder %s1142_s14, %s1138_s13 }
   0x7   : > { %p128_p2 = scmp.eq.s32.totalorder %s810_s18, 1  ;;  %p133_p3 = scmp.ne.s32.totalorder %s1138_s13, %s1134_s12 }
   0x8   : > { %s1572_s20 = smov (%p30_p0, %s28_s20), 0  ;;  %p134_p5 = scmp.eq.s32.totalorder %s811_s19, 1 }
   0x9   : > { %p1253_p4 = por %p128_p2, %p127_p1  ;;  %s112_s23 = ssub.s32 %s1150_s16, %s1572_s20 }
   0xa   : > { %p815_p6 = scmp.ge.s32.totalorder %s1154_s17, 1  ;;  %p115_p7 = scmp.eq.s32.totalorder %s112_s23, 0 }
   0xb   : > { %p1260_p8 = por %p134_p5, %p133_p3  ;;  %p182_p9 = scmp.lt.s32.totalorder %s1154_s17, 3 }
   0xc   : > { %s1266_s25 = scalar_select %p115_p7, %s1142_s14, %s117_s21  }
   0xd   : > { %p183_p10 = pnand %p815_p6, %p182_p9 }
   0xe   : > { %s217_s26 = sand.u32 (!%p183_p10), 1, %s1138_s13   ;;  %p227_p11 = scmp.lt.s32.totalorder (!%p183_p10), %s1146_s15, 1  ;;  %v1273_v0 = vld [vmem:[%s1550_s0] sm:$0xff] (!%p183_p10)  ;;  %v1278_v1 = vld [vmem:[%s1550_s0 + $0x8] sm:$0xff] (!%p183_p10)  ;;  %v272_v2 = vlaneseq (!%p183_p10)  ;;  %v1334_v24 = vmov (!%p183_p10), 0.0   ;;  %v1336_v25 = vmov (!%p183_p10), 0.0  }
   0xf   : > { %186 = sbr.rel (%p183_p10) target bundleno = 571 (0x23b), region = 32  ;;  %s1282_s4 = sshll.u32 (!%p183_p10), %s217_s26, 2  ;;  %v244_v3 = vunpack.c.0.s8 (!%p183_p10), %v1273_v0  ;;  %v245_v4 = vunpack.c.1.s8 (!%p183_p10), %v1273_v0  ;;  %v246_v5 = vunpack.c.2.s8 (!%p183_p10), %v1273_v0  ;;  %v247_v6 = vunpack.c.3.s8 (!%p183_p10), %v1273_v0 }
  0x10   : > { %v248_v7 = vunpack.c.0.s8 (!%p183_p10), %v1278_v1  ;;  %v249_v8 = vunpack.c.1.s8 (!%p183_p10), %v1278_v1  ;;  %v250_v9 = vunpack.c.2.s8 (!%p183_p10), %v1278_v1  ;;  %v251_v10 = vunpack.c.3.s8 (!%p183_p10), %v1278_v1  ;;  %s219_s19 = scalar_lea.vmem (!%p183_p10), [#allocation2], %s1282_s4  ;;  %s1350_s21 = smov (!%p183_p10), 0  }
  0x11   : > { %v1293_v11 = vcvt.s32.f32 (!%p183_p10), %v244_v3  ;;  %v1295_v12 = vcvt.s32.f32 (!%p183_p10), %v245_v4  ;;  %v1297_v13 = vcvt.s32.f32 (!%p183_p10), %v246_v5  ;;  %v1299_v14 = vcvt.s32.f32 (!%p183_p10), %v247_v6 }
  0x12   : > { %v1301_v15 = vcvt.s32.f32 (!%p183_p10), %v248_v7  ;;  %v1303_v16 = vcvt.s32.f32 (!%p183_p10), %v249_v8  ;;  %v1305_v17 = vcvt.s32.f32 (!%p183_p10), %v250_v9  ;;  %v1307_v18 = vcvt.s32.f32 (!%p183_p10), %v251_v10 }
  0x13   : > { %vm260_vm0 = vcmp.gt.f32.partialorder (!%p183_p10), %v1293_v11, 0.0  ;;  %vm261_vm1 = vcmp.gt.f32.partialorder (!%p183_p10), %v1295_v12, 0.0  ;;  %vm262_vm2 = vcmp.gt.f32.partialorder (!%p183_p10), %v1297_v13, 0.0  ;;  %vm263_vm3 = vcmp.gt.f32.partialorder (!%p183_p10), %v1299_v14, 0.0 }
  0x14   : > { %vm264_vm4 = vcmp.gt.f32.partialorder (!%p183_p10), %v1301_v15, 0.0  ;;  %vm265_vm5 = vcmp.gt.f32.partialorder (!%p183_p10), %v1303_v16, 0.0  ;;  %vm266_vm6 = vcmp.gt.f32.partialorder (!%p183_p10), %v1305_v17, 0.0  ;;  %vm267_vm7 = vcmp.gt.f32.partialorder (!%p183_p10), %v1307_v18, 0.0 }
  0x15   : > { %v268_v19 = vunpack.c.l.s8.bf16 (!%p183_p10), %v1273_v0  ;;  %v269_v20 = vunpack.c.h.s8.bf16 (!%p183_p10), %v1273_v0  ;;  %v270_v21 = vunpack.c.l.s8.bf16 (!%p183_p10), %v1278_v1  ;;  %v271_v22 = vunpack.c.h.s8.bf16 (!%p183_p10), %v1278_v1 }
  0x16   : > { %s228_s5 = scalar_select %p227_p11, %s1146_s15, 1  ;;  %v1331_v23 = vand.u32 127, %v272_v2  ;;  %v1338_v26 = vmov 0.0   ;;  %v1340_v27 = vmov 0.0   ;;  %v1342_v28 = vmov 0.0  }
  0x17   : > { %v1344_v29 = vmov 0.0   ;;  %v1346_v30 = vmov 0.0   ;;  %v1348_v31 = vmov 0.0  }
  0x18   : > { %s844_s6 = sshll.u32 %s228_s5, 7 }
  0x19   : > { %s1316_s9 = scalar_lea.vmem %s1551_s1, %s844_s6  ;;  %s1321_s18 = scalar_lea.vmem %s1552_s2, %s844_s6 }
  0x1a LB: >> { %vm447_vm8 = vcmask 523264   ;;  %s846_s23 = sshll.u32 %s1190_s21, 5  ;;  %vm349_vm9 = vcmask 261120   ;;  %s1190_s21 = sphi %s1350_s21, %s279_s21   ;;  %v1186_v31 = vphi %v1348_v31, %v1565_v31   ;;  %v1182_v30 = vphi %v1346_v30, %v1564_v30   ;;  %v1178_v29 = vphi %v1344_v29, %v1563_v29   ;;  %v1174_v28 = vphi %v1342_v28, %v1562_v28   ;;  %v1170_v27 = vphi %v1340_v27, %v1561_v27   ;;  %v1166_v26 = vphi %v1338_v26, %v1560_v26   ;;  %v1162_v25 = vphi %v1336_v25, %v1559_v25   ;;  %v1158_v24 = vphi %v1334_v24, %v1558_v24  }
  0x1b   : >> { %888 = vmatprep.mubr.msk.bf16.mxu1 %vm447_vm8, %v268_v19  ;;  %s300_s27 = scalar_lea.vmem %s1321_s18, %s846_s23  ;;  %s1385_s28 = scalar_lea.vmem %s1316_s9, %s846_s23 }
  0x1c   : >> { %v1028_v32 = vld [vmem:[%s300_s27] sm:$0xff]   ;;  %v1029_v33 = vld [vmem:[%s300_s27 + $0x8] sm:$0xff]   ;;  %v1030_v35 = vld [vmem:[%s300_s27 + $0x10] sm:$0xff]  }
  0x1d   : >> { %896 = vmatprep.subr.msk.bf16.mxu0 %vm349_vm9, %v1028_v32  ;;  %880 = vmatprep.subr.bf16.mxu1 %v1028_v32  ;;  %v363_v34 = vsel %vm349_vm9, %v1028_v32, 0  ;;  %v291_v36 = vld [vmem:[%s1385_s28] sm:$0xff]   ;;  %v366_v37 = vsel %vm349_vm9, %v1029_v33, 0  ;;  %v1031_v38 = vld [vmem:[%s300_s27 + $0x18] sm:$0xff]   ;;  %v369_v39 = vsel %vm349_vm9, %v1030_v35, 0  ;;  %v293_v41 = vld [vmem:[%s1385_s28 + $0x8] sm:$0xff]  }
  0x1e   : >> { %865 = vmatpush3.bf16.xpose.msra.mxu0 %v363_v34  ;;  %881 = vmatpush3.bf16.msra.mxu1 %v1028_v32  ;;  %v372_v40 = vsel %vm349_vm9, %v1031_v38, 0  ;;  %v295_v42 = vld [vmem:[%s1385_s28 + $0x10] sm:$0xff]   ;;  %v297_v43 = vld [vmem:[%s1385_s28 + $0x18] sm:$0xff]   ;;  %v555_v44 = vunpack.c.l.bf16 %v293_v41  ;;  %v553_v45 = vunpack.c.l.bf16 %v291_v36  ;;  %v556_v46 = vunpack.c.h.bf16 %v293_v41 }
  0x1f   : >> { %882 = vmatprep.subr.bf16.mxu1 %v1029_v33  ;;  %897 = vmatprep.subr.msk.bf16.mxu0 %vm349_vm9, %v1029_v33  ;;  %v554_v48 = vunpack.c.h.bf16 %v291_v36  ;;  %v559_v58 = vunpack.c.l.bf16 %v297_v43  ;;  %v560_v60 = vunpack.c.h.bf16 %v297_v43  ;;  %v557_v62 = vunpack.c.l.bf16 %v295_v42 }
  0x20   : >> { %872 = vmatprep.mubr.msk.bf16.mxu0 %vm349_vm9, %v291_v36  ;;  %v558_v4 = vunpack.c.h.bf16 %v295_v42 }
  0x22   : >> { %883 = vmatpush3.bf16.msra.mxu1 %v1029_v33 }
  0x23   : >> { %884 = vmatprep.subr.bf16.mxu1 %v1030_v35 }
  0x26   : >> { %867 = vmatpush3.bf16.xpose.msra.mxu0 %v366_v37  ;;  %885 = vmatpush3.bf16.msra.mxu1 %v1030_v35 }
  0x27   : >> { %886 = vmatprep.subr.bf16.mxu1 %v1031_v38  ;;  %898 = vmatprep.subr.msk.bf16.mxu0 %vm349_vm9, %v1030_v35 }
  0x2a   : >> { %887 = vmatpush3.bf16.msra.mxu1 %v1031_v38 }
  0x2d   : >> { %889 = vmatmul.mubr.msk.bf16.vlgmr.msra.gmra.mrb[0].mxu1 %vm447_vm8, %v269_v20 }
  0x2e   : >> { %869 = vmatpush3.bf16.xpose.msra.mxu0 %v369_v39  ;;  %892 = vmatprep.mubr.msk.bf16.mxu1 %vm447_vm8, %v270_v21 }
  0x2f   : >> { %899 = vmatprep.subr.msk.bf16.mxu0 %vm349_vm9, %v1031_v38 }
  0x35   : >> { %893 = vmatmul.mubr.msk.bf16.gmra.mrb[4].mxu1 %vm447_vm8, %v271_v22 }
  0x36   : >> { %871 = vmatpush3.bf16.xpose.msra.mxu0 %v372_v40 }
  0x3d   : >> { %873 = vmatmul.mubr.msk.bf16.vlgmr.msra.gmra.mrb[0].mxu0 %vm349_vm9, %v293_v41 }
  0x3e   : >> { %876 = vmatprep.mubr.msk.bf16.mxu0 %vm349_vm9, %v295_v42 }
  0x45   : >> { %877 = vmatmul.mubr.msk.bf16.gmra.mrb[4].mxu0 %vm349_vm9, %v297_v43 }
 0x100   : >> { %v890_v47 = vpop.f32.mrb[0].mxu1 }
 0x101   : >> { %v563_v49 = vmul.f32 %v890_v47, %v555_v44  ;;  %v522_v50 = vpop.f32.mrb[1].mxu1 }
 0x102   : >> { %v561_v51 = vmul.f32 %v553_v45, %v522_v50  ;;  %v891_v52 = vpop.f32.mrb[2].mxu1 }
 0x103   : >> { %v564_v53 = vmul.f32 %v891_v52, %v556_v46  ;;  %v525_v54 = vpop.f32.mrb[3].mxu1  ;;  %v575_v55 = vsel %vm349_vm9, %v563_v49, 0.0 }
 0x104   : >> { %v562_v56 = vmul.f32 %v554_v48, %v525_v54  ;;  %576 = vadd.xlane.f32.xlu1 %v575_v55  ;;  %v569_v57 = vsel %vm349_vm9, %v561_v51, 0.0 }
 0x105   : >> { %570 = vadd.xlane.f32.xlu0 %v569_v57  ;;  %v578_v59 = vsel %vm349_vm9, %v564_v53, 0.0 }
 0x106   : >> { %v572_v63 = vsel %vm349_vm9, %v562_v56, 0.0 }
 0x108   : >> { %v894_v61 = vpop.f32.mrb[4].mxu1  ;;  %579 = vadd.xlane.f32.xlu1 %v578_v59 }
 0x109   : >> { %v567_v2 = vmul.f32 %v894_v61, %v559_v58  ;;  %v538_v3 = vpop.f32.mrb[5].mxu1  ;;  %573 = vadd.xlane.f32.xlu0 %v572_v63 }
 0x10a   : >> { %v895_v5 = vpop.f32.mrb[6].mxu1  ;;  %v565_v9 = vmul.f32 %v557_v62, %v538_v3 }
 0x10b   : >> { %v568_v6 = vmul.f32 %v895_v5, %v560_v60  ;;  %v541_v7 = vpop.f32.mrb[7].mxu1  ;;  %v587_v8 = vsel %vm349_vm9, %v567_v2, 0.0  ;;  %v609_v5 = vstv %s1190_s21  ;;  %s279_s21 = sadd.s32 1, %s1190_s21  }
 0x10c   : >> { %v566_v10 = vmul.f32 %v558_v4, %v541_v7  ;;  %v581_v34 = vsel %vm349_vm9, %v565_v9, 0.0  ;;  %vm1446_vm10 = vcmp.eq.s32.totalorder %v1331_v23, %v609_v5  ;;  %p276_p12 = scmp.ge.s32.totalorder %s279_s21, 4  }
 0x10d   : >> { %588 = vadd.xlane.f32.xlu0 %v587_v8  ;;  %v590_v32 = vsel %vm349_vm9, %v568_v6, 0.0  ;;  %s841_s29 = sshll.u32 (%p276_p12), %s1146_s15, 6  ;;  %s676_s30 = sshll.u32 (%p276_p12), %s219_s19, 4  ;;  %vm659_vm11 = vcmask (%p276_p12), 519168   ;;  %s1501_s30 = int_to_ptr.vmem [resolvable:$true] %s676_s30 }
 0x10e   : >> { %591 = vadd.xlane.f32.xlu1 %v590_v32  ;;  %v584_v37 = vsel %vm349_vm9, %v566_v10, 0.0  ;;  %s1499_s7 = scalar_lea.hbm (%p276_p12), %s1553_s3, %s841_s29  ;;  %s662_s8 = scalar_lea.sflag (%p276_p12), [#allocation3], %s217_s26 }
 0x10f   : > { %s1040_s9 = scalar_lea.vmem (%p276_p12), %s1501_s30, 64  ;;  %s1192_s15 = smov (%p276_p12), [#allocation2]  }
 0x110   : >> { %v874_v33 = vpop.f32.mrb[0].mxu0  ;;  %p1041_p13 = scmp.ne.s32.totalorder (%p276_p12), %s1501_s30, %s1040_s9  ;;  %s1044_s10 = sshll.u32 (%p276_p12), %s1192_s15, 4  ;;  %s1045_s10 = int_to_ptr.vmem [resolvable:$false] %s1044_s10 }
 0x111   : >> { %v441_v35 = vsel %vm262_vm2, %v874_v33, -inf  ;;  %582 = vadd.xlane.f32.xlu0 %v581_v34  ;;  %v408_v36 = vpop.f32.mrb[1].mxu0  ;;  %s1046_s11 = scalar_lea.vmem (%p276_p12), %s1045_s10, 128  ;;  %p1047_p2 = scmp.lt.s32.totalorder (%p276_p12), %s1501_s30, %s1045_s10 }
 0x112   : >> { %585 = vadd.xlane.f32.xlu1 %v584_v37  ;;  %v875_v38 = vpop.f32.mrb[2].mxu0  ;;  %v454_v41 = vsel %vm447_vm8, %v441_v35, -inf  ;;  %v439_v43 = vsel %vm260_vm0, %v408_v36, -inf  ;;  %p1042_p0 = pnand (%p276_p12), %p1041_p13, %p1253_p4  ;;  %p1048_p3 = scmp.lt.s32.totalorder (%p276_p12), %s1046_s11, %s1040_s9 }
 0x113   : >> { %v442_v39 = vsel %vm263_vm3, %v875_v38, -inf  ;;  %v411_v40 = vpop.f32.mrb[3].mxu0  ;;  %v448_v46 = vsel %vm447_vm8, %v439_v43, -inf }
 0x114   : >> { %v457_v42 = vsel %vm447_vm8, %v442_v39, -inf  ;;  %v440_v44 = vsel %vm261_vm1, %v411_v40, -inf  ;;  %p1043_p1 = pneg (%p276_p12), %p1042_p0  ;;  %p1049_p5 = por (%p276_p12), %p1048_p3, %p1047_p2 }
 0x115   : >> { %455 = vmax.xlane.f32.xlu0 %v454_v41  ;;  %v451_v48 = vsel %vm447_vm8, %v440_v44, -inf }
 0x116   : >> { %458 = vmax.xlane.f32.xlu1 %v457_v42  ;;  %p1050_p6 = pnand (%p276_p12), %p1049_p5, %p1043_p1 }
 0x118   : >> { %v878_v45 = vpop.f32.mrb[4].mxu0 }
 0x119   : >> { %449 = vmax.xlane.f32.xlu0 %v448_v46  ;;  %v424_v47 = vpop.f32.mrb[5].mxu0  ;;  %v445_v54 = vsel %vm266_vm6, %v878_v45, -inf }
 0x11a   : >> { %v443_v49 = vsel %vm264_vm4, %v424_v47, -inf  ;;  %452 = vmax.xlane.f32.xlu1 %v451_v48  ;;  %v879_v50 = vpop.f32.mrb[6].mxu0  ;;  %v466_v57 = vsel %vm447_vm8, %v445_v54, -inf }
 0x11b   : >> { %v427_v51 = vpop.f32.mrb[7].mxu0  ;;  %v460_v52 = vsel %vm447_vm8, %v443_v49, -inf  ;;  %v446_v56 = vsel %vm267_vm7, %v879_v50, -inf }
 0x11c   : >> { %v444_v53 = vsel %vm265_vm5, %v427_v51, -inf  ;;  %v469_v58 = vsel %vm447_vm8, %v446_v56, -inf }
 0x11d   : >> { %461 = vmax.xlane.f32.xlu0 %v460_v52  ;;  %v463_v55 = vsel %vm447_vm8, %v444_v53, -inf }
 0x11e   : >> { %464 = vmax.xlane.f32.xlu1 %v463_v55 }
 0x121   : >> { %467 = vmax.xlane.f32.xlu0 %v466_v57 }
 0x122   : >> { %470 = vmax.xlane.f32.xlu1 %v469_v58 }
 0x191   : >> { %v577_v59 = vpop.xlane.xlu1 %576 }
 0x192   : >> { %v571_v60 = vpop.xlane.xlu0 %570  ;;  %v595_v6 = vmul.f32 0.015625, %v577_v59 }
 0x193   : >> { %v593_v34 = vmul.f32 0.015625, %v571_v60 }
 0x195   : >> { %v580_v62 = vpop.xlane.xlu1 %579 }
 0x196   : >> { %v574_v61 = vpop.xlane.xlu0 %573  ;;  %v596_v7 = vmul.f32 0.015625, %v580_v62 }
 0x197   : >> { %v594_v36 = vmul.f32 0.015625, %v574_v61 }
 0x19a   : >> { %v589_v63 = vpop.xlane.xlu0 %588 }
 0x19b   : >> { %v592_v2 = vpop.xlane.xlu1 %591 }
 0x19c   : >> { %v600_v54 = vmul.f32 0.015625, %v592_v2 }
 0x19e   : >> { %v583_v3 = vpop.xlane.xlu0 %582 }
 0x19f   : >> { %v586_v4 = vpop.xlane.xlu1 %585  ;;  %v597_v44 = vmul.f32 0.015625, %v583_v3 }
 0x1a0   : >> { %v598_v46 = vmul.f32 0.015625, %v586_v4 }
 0x1a2   : >> { %v456_v9 = vpop.xlane.xlu0 %455 }
 0x1a3   : >> { %v603_v10 = vsub.f32 %v456_v9, %v595_v6  ;;  %v459_v32 = vpop.xlane.xlu1 %458 }
 0x1a4   : >> { %v604_v33 = vsub.f32 %v459_v32, %v596_v7 }
 0x1a5   : >> { %v613_v35 = vsel %vm1446_vm10, %v603_v10, 0.0 }
 0x1a6   : >> { %v621_v37 = vadd.f32 %v1178_v29, %v613_v35   ;;  %v614_v38 = vsel %vm1446_vm10, %v604_v33, 0.0  ;;  %v450_v39 = vpop.xlane.xlu0 %449 }
 0x1a7   : >> { %v622_v40 = vadd.f32 %v1174_v28, %v614_v38   ;;  %v601_v41 = vsub.f32 %v450_v39, %v593_v34  ;;  %v453_v42 = vpop.xlane.xlu1 %452  ;;  %v599_v28 = vmul.f32 0.015625, %v589_v63 }
 0x1a8   : >> { %v602_v43 = vsub.f32 %v453_v42, %v594_v36 }
 0x1a9   : >> { %v611_v45 = vsel %vm1446_vm10, %v601_v41, 0.0 }
 0x1aa   : >> { %v619_v47 = vadd.f32 %v1186_v31, %v611_v45   ;;  %v612_v48 = vsel %vm1446_vm10, %v602_v43, 0.0  ;;  %v462_v29 = vpop.xlane.xlu0 %461 }
 0x1ab   : >> { %v620_v49 = vadd.f32 %v1182_v30, %v612_v48   ;;  %v605_v50 = vsub.f32 %v462_v29, %v597_v44  ;;  %v465_v51 = vpop.xlane.xlu1 %464  ;;  %v1563_v29 = vmov %v621_v37 }
 0x1ac   : >> { %v606_v52 = vsub.f32 %v465_v51, %v598_v46  ;;  %627 = vxpose.xlu0.b32.start [1/8] (short) (narrow) (%p276_p12), %v619_v47, 8 }
 0x1ad   : >> { %v615_v53 = vsel %vm1446_vm10, %v605_v50, 0.0 }
 0x1ae   : >> { %v623_v55 = vadd.f32 %v1170_v27, %v615_v53   ;;  %v616_v56 = vsel %vm1446_vm10, %v606_v52, 0.0  ;;  %v468_v31 = vpop.xlane.xlu0 %467 }
 0x1af   : >> { %v624_v57 = vadd.f32 %v1166_v26, %v616_v56   ;;  %v607_v58 = vsub.f32 %v468_v31, %v599_v28  ;;  %v471_v59 = vpop.xlane.xlu1 %470  ;;  %v1562_v28 = vmov %v622_v40  ;;  %v1565_v31 = vmov %v619_v47  ;;  %278 = sbr.rel (!%p276_p12) target bundleno = 26 (0x1a), region = 82 }
 0x1b0   : >> { %v608_v60 = vsub.f32 %v471_v59, %v600_v54  ;;  %v1561_v27 = vmov %v623_v55  ;;  %628 = vxpose.xlu0.b32.cont [2/8] (short) (narrow) (%p276_p12), %v620_v49, 8 }
 0x1b1   : >> { %v617_v30 = vsel %vm1446_vm10, %v607_v58, 0.0  ;;  %v1560_v26 = vmov %v624_v57 }
 0x1b2   : >> { %v625_v61 = vadd.f32 %v1162_v25, %v617_v30   ;;  %v618_v62 = vsel %vm1446_vm10, %v608_v60, 0.0  ;;  %v1564_v30 = vmov %v620_v49 }
 0x1b3   : >> { %v626_v63 = vadd.f32 %v1158_v24, %v618_v62  }
 0x1b4   : >> { %v1559_v25 = vmov %v625_v61  ;;  %629 = vxpose.xlu0.b32.cont [3/8] (short) (narrow) (%p276_p12), %v621_v37, 8 }
 0x1b5   : >> { %v1558_v24 = vmov %v626_v63 }
 0x1b8   : > { %630 = vxpose.xlu0.b32.cont [4/8] (short) (narrow) %v622_v40, 8 }
 0x1bc   : > { %631 = vxpose.xlu0.b32.cont [5/8] (short) (narrow) %v623_v55, 8 }
 0x1c0   : > { %632 = vxpose.xlu0.b32.cont [6/8] (short) (narrow) %v624_v57, 8 }
 0x1c4   : > { %633 = vxpose.xlu0.b32.cont [7/8] (short) (narrow) %v625_v61, 8 }
 0x1c8   : > { %634 = vxpose.xlu0.b32.end [8/8] (short) (narrow) %v626_v63, 8 }
 0x22c   : > { %v643_v0 = vpop.trf.xlu0 }
 0x22d   : > { %660 = vst.msk [vmem:[%s219_s19] sm:$0xf] %vm659_vm11, %v643_v0 }
 0x22e   : > { %1053 = shalt.err (!%p1050_p6)
}
 0x22f   : > { %s1054_s26 = scalar_lea.hbm %s1499_s7, 64  ;;  %s1058_s19 = scalar_lea.hbm %s1553_s3, 128 }
 0x230   : > { %p1055_p7 = scmp.ne.s32.totalorder %s1499_s7, %s1054_s26  ;;  %p1059_p11 = scmp.lt.u32.totalorder %s1499_s7, %s1553_s3 }
 0x231   : > { %p1060_p12 = scmp.lt.u32.totalorder %s1058_s19, %s1054_s26  ;;  %p1062_p0 = scmp.lt.u32.totalorder %s1054_s26, %s1499_s7 }
 0x232   : > { %p1056_p9 = pnand %p1055_p7, %p1253_p4 }
 0x233   : > { %p1061_p13 = por %p1060_p12, %p1059_p11 }
 0x234   : > { %p1057_p10 = pneg %p1056_p9 }
 0x235   : > { %p1063_p1 = por %p1062_p0, %p1061_p13 }
 0x237   : > { %p1064_p2 = pnand %p1063_p1, %p1057_p10 }
 0x239   : > { %1067 = shalt.err (!%p1064_p2)
}
 0x23a   : > { %900 = dma.vmem_to_hbm [thread:$0]  (%p1253_p4), %s1501_s30, 64, %s1499_s7, %s662_s8  }
 0x23b PF: > { %p906_p3 = scmp.ge.s32.totalorder %s1154_s17, 2  ;;  %s688_s27 = sand.u32 1, %s1134_s12  }
 0x23c   : > { %s689_s28 = scalar_lea.sflag [#allocation3], %s688_s27 }
 0x23d   : > { %p903_p5 = pnand %p906_p3, %p1260_p8 }
 0x23f   : > { %1129 = dma.done.wait (!%p903_p5), %s689_s28, 64  }
 0x240   : > { %1131 = vsyncadd (!%p903_p5), %s689_s28, 4294967232  ;;  %s16_s17 = sadd.s32 1, %s1154_s17   ;;  %s1566_s12 = smov %s1138_s13 }
 0x241   : > { %p13_p6 = scmp.ge.s32.totalorder %s16_s17, 4   ;;  %s1567_s13 = smov %s1142_s14 }
 0x242   : > { %s1568_s14 = smov %s1266_s25  ;;  %s1569_s15 = smov %s1150_s16 }
 0x243   : > { %s1570_s16 = smov %s1572_s20  ;;  %15 = sbr.rel (!%p13_p6) target bundleno = 4 (0x4), region = 93 }
 0x24a   :  { %694 = vsyncpa [#allocation3], 1 }
 0x24b   :  { %696 = vsyncpa [#allocation3 + $0x1], 1 }

</bundles_post_ra>
